<compile_context>
chip_gen: v7x
topology: tpu7x:2x2x1
jax: 0.10.0
libtpu: 0.0.40
codegen_flags: <defaults>
</compile_context>

<pallas_src>
import math

import jax
import jax.numpy as jnp
from jax.experimental import pallas as pl
from jax.experimental.pallas import tpu as pltpu

# TODO(synk): STATE_KEYS / CONTROLS_KEYS come from an unavailable module;
# synthetic sizes are used (forward-pass structure is unchanged).
N_STATE = 10                      # len(STATE_KEYS)
N_CONTROLS = 6                    # len(CONTROLS_KEYS)
D_IN = N_STATE + N_CONTROLS       # 16
HIDDEN = 32                       # hidden_size (> 8, multiple of 8)
D_IN_PAD = HIDDEN                 # fc1 input padded to 32 sublanes
LANE = 128                        # lane width; batch padded to a multiple


def _round_up(x, m):
    return (x + m - 1) // m * m


# ---- packed parameter slab: (128 rows x 32 lanes) fp32, all sections 8-aligned
ROW_W1 = 0            # W1  (H, D_IN_PAD): cols [D_IN, 32) are zero
ROW_W2 = HIDDEN       # W2  (H, H)
ROW_W3 = 2 * HIDDEN   # W3  (H, H)
ROW_MISC = 3 * HIDDEN # misc block (H, 32): col0=b1, col1=b2, col2=b3,
                      #                     col3=w4 column, [row0,col4]=b4
N_ROWS = 4 * HIDDEN   # 128


def critic_kernel(x_ref, p_ref, o_ref):
    # x_ref: (D_IN_PAD, Bp) fp32 -- rows >= D_IN and lanes >= B are zero.
    x = x_ref[...]

    w1 = p_ref[ROW_W1:ROW_W1 + HIDDEN, :]          # (H, D_IN_PAD)
    w2 = p_ref[ROW_W2:ROW_W2 + HIDDEN, :]          # (H, H)
    w3 = p_ref[ROW_W3:ROW_W3 + HIDDEN, :]          # (H, H)
    misc = p_ref[ROW_MISC:ROW_MISC + HIDDEN, :]    # (H, 32)
    b1 = misc[:, 0:1]                              # (H, 1) broadcast over lanes
    b2 = misc[:, 1:2]
    b3 = misc[:, 2:3]
    w4 = misc[:, 3:4]                              # (H, 1) fc4 weight column
    b4 = misc[0:1, 4:5]                            # (1, 1) fc4 bias

    bf = jnp.bfloat16
    # fc1 (single fused dot; zero-padded rows/cols contribute nothing)
    h = jnp.dot(w1.astype(bf), x.astype(bf), preferred_element_type=jnp.float32)
    h = jnp.maximum(h + b1, 0.0)
    # fc2 / fc3 -- bf16 MXU operands, fp32 accumulate + epilogue
    h = jnp.dot(w2.astype(bf), h.astype(bf), preferred_element_type=jnp.float32)
    h = jnp.maximum(h + b2, 0.0)
    h = jnp.dot(w3.astype(bf), h.astype(bf), preferred_element_type=jnp.float32)
    h = jnp.maximum(h + b3, 0.0)
    # fc4: VPU multiply + sublane reduce -> lane-dense (1, Bp) row (no 4th MXU drain)
    out = jnp.sum(h * w4, axis=0, keepdims=True) + b4
    o_ref[...] = out.astype(o_ref.dtype)


def pack_critic_params(params):
    """Pack (w, b) pairs (weights in (in, out) orientation) into one slab."""
    (w1, b1), (w2, b2), (w3, b3), (w4, b4) = params
    p = jnp.zeros((N_ROWS, HIDDEN), jnp.float32)
    p = p.at[ROW_W1:ROW_W1 + HIDDEN, :D_IN].set(w1.T)     # (H, D_IN)
    p = p.at[ROW_W2:ROW_W2 + HIDDEN, :].set(w2.T)
    p = p.at[ROW_W3:ROW_W3 + HIDDEN, :].set(w3.T)
    p = p.at[ROW_MISC:ROW_MISC + HIDDEN, 0].set(b1)
    p = p.at[ROW_MISC:ROW_MISC + HIDDEN, 1].set(b2)
    p = p.at[ROW_MISC:ROW_MISC + HIDDEN, 2].set(b3)
    p = p.at[ROW_MISC:ROW_MISC + HIDDEN, 3].set(w4[:, 0])
    p = p.at[ROW_MISC, 4].set(b4[0])
    return p


def critic_forward(state, action, packed_params):
    """state: (B, N_STATE), action: (B, N_CONTROLS) -> (B, 1)."""
    B = state.shape[0]
    # Layout plumbing (not compute hoisting): pack state|action once and put
    # batch on the lane axis, zero-padded to (D_IN_PAD, Bp).
    x = jnp.concatenate([state, action], axis=1).astype(jnp.float32)   # (B, 16)
    Bp = _round_up(max(B, LANE), LANE)
    xt = jnp.zeros((D_IN_PAD, Bp), jnp.float32).at[:D_IN, :B].set(x.T)

    flops = 2 * Bp * (HIDDEN * D_IN_PAD + 2 * HIDDEN * HIDDEN + HIDDEN)
    bytes_accessed = 4 * (N_ROWS * HIDDEN + D_IN_PAD * Bp + Bp)

    vmem = pl.BlockSpec(memory_space=pltpu.MemorySpace.VMEM)
    out_row = pl.pallas_call(
        critic_kernel,
        out_shape=jax.ShapeDtypeStruct((1, Bp), jnp.float32),
        in_specs=[vmem, vmem],
        out_specs=vmem,
        cost_estimate=pl.CostEstimate(
            flops=flops, transcendentals=0, bytes_accessed=bytes_accessed),
    )(xt, packed_params)
    return out_row[0, :B].reshape(B, 1)


def init_linear(key, fan_in, fan_out):
    """torch.nn.Linear default init; weight returned as (fan_in, fan_out)."""
    kw, kb = jax.random.split(key)
    bound = 1.0 / math.sqrt(fan_in)
    w = jax.random.uniform(kw, (fan_in, fan_out), jnp.float32, -bound, bound)
    b = jax.random.uniform(kb, (fan_out,), jnp.float32, -bound, bound)
    return w, b


def init_critic_params(key, hidden_size=HIDDEN):
    k1, k2, k3, k4 = jax.random.split(key, 4)
    return (
        init_linear(k1, D_IN, hidden_size),
        init_linear(k2, hidden_size, hidden_size),
        init_linear(k3, hidden_size, hidden_size),
        init_linear(k4, hidden_size, 1),
    )


if __name__ == "__main__":
    key = jax.random.PRNGKey(0)
    kp, ks, ka = jax.random.split(key, 3)

    params = init_critic_params(kp)
    packed = pack_critic_params(params)           # packed once, outside forward

    BATCH = 128                                   # one full lane row of batch
    state = jax.random.normal(ks, (BATCH, N_STATE), jnp.float32)
    action = jax.random.normal(ka, (BATCH, N_CONTROLS), jnp.float32)

    out = critic_forward(state, action, packed)
    jax.block_until_ready(out)

    # Pure-JAX fp32 reference of the original torch forward (concat formulation).
    def ref(state, action, params):
        x = jnp.concatenate([state, action], axis=1)
        (w1, b1), (w2, b2), (w3, b3), (w4, b4) = params
        x = jax.nn.relu(x @ w1 + b1)
        x = jax.nn.relu(x @ w2 + b2)
        x = jax.nn.relu(x @ w3 + b3)
        return x @ w4 + b4

    expected = ref(state, action, params)
    assert out.shape == (BATCH, 1), out.shape
    # Tolerance loosened for bf16 MXU operands (fp32 accumulate / epilogue).
    assert jnp.allclose(out, expected, atol=3e-2, rtol=3e-2), (out, expected)

    print("KERNEL_OK")
</pallas_src>

<mosaic_0001>
module attributes {stable_mosaic.version = 11 : i64} {
  func.func @critic_kernel(%arg0: memref<32x128xf32, #tpu.memory_space<vmem>>, %arg1: memref<128x32xf32, #tpu.memory_space<vmem>>, %arg2: memref<1x128xf32, #tpu.memory_space<vmem>>) attributes {dimension_semantics = [], scalar_prefetch = 0 : i64, scratch_operands = 0 : i64, tpu.core_type = #tpu.core_type<tc>} {
    %c0 = arith.constant 0 : index
    %c0_0 = arith.constant 0 : index
    %0 = vector.load %arg0[%c0, %c0_0] : memref<32x128xf32, #tpu.memory_space<vmem>>, vector<32x128xf32>
    %c0_1 = arith.constant 0 : index
    %c0_2 = arith.constant 0 : index
    %1 = vector.load %arg1[%c0_1, %c0_2] : memref<128x32xf32, #tpu.memory_space<vmem>>, vector<32x32xf32>
    %c32 = arith.constant 32 : index
    %c0_3 = arith.constant 0 : index
    %2 = vector.load %arg1[%c32, %c0_3] : memref<128x32xf32, #tpu.memory_space<vmem>>, vector<32x32xf32>
    %c64 = arith.constant 64 : index
    %c0_4 = arith.constant 0 : index
    %3 = vector.load %arg1[%c64, %c0_4] : memref<128x32xf32, #tpu.memory_space<vmem>>, vector<32x32xf32>
    %c96 = arith.constant 96 : index
    %c0_5 = arith.constant 0 : index
    %4 = vector.load %arg1[%c96, %c0_5] : memref<128x32xf32, #tpu.memory_space<vmem>>, vector<32x32xf32>
    %5 = vector.extract_strided_slice %4 {offsets = [0, 0], sizes = [32, 1], strides = [1, 1]} : vector<32x32xf32> to vector<32x1xf32>
    %6 = vector.extract_strided_slice %4 {offsets = [0, 1], sizes = [32, 1], strides = [1, 1]} : vector<32x32xf32> to vector<32x1xf32>
    %7 = vector.extract_strided_slice %4 {offsets = [0, 2], sizes = [32, 1], strides = [1, 1]} : vector<32x32xf32> to vector<32x1xf32>
    %8 = vector.extract_strided_slice %4 {offsets = [0, 3], sizes = [32, 1], strides = [1, 1]} : vector<32x32xf32> to vector<32x1xf32>
    %9 = vector.extract_strided_slice %4 {offsets = [0, 4], sizes = [1, 1], strides = [1, 1]} : vector<32x32xf32> to vector<1x1xf32>
    %10 = arith.truncf %1 : vector<32x32xf32> to vector<32x32xbf16>
    %11 = arith.truncf %0 : vector<32x128xf32> to vector<32x128xbf16>
    %cst = arith.constant dense<0.000000e+00> : vector<32x128xf32>
    %12 = tpu.matmul %10, %11, %cst {dimension_numbers = #tpu.dot_dimension_numbers<[1], [0], [0], [1], [0, 0, 1, 1], [], []>} : vector<32x32xbf16>, vector<32x128xbf16>, vector<32x128xf32> -> vector<32x128xf32>
    %13 = vector.broadcast %5 : vector<32x1xf32> to vector<32x128xf32>
    %14 = arith.addf %12, %13 : vector<32x128xf32>
    %cst_6 = arith.constant 0.000000e+00 : f32
    %15 = vector.broadcast %cst_6 : f32 to vector<32x128xf32>
    %16 = arith.maximumf %14, %15 : vector<32x128xf32>
    %17 = arith.truncf %2 : vector<32x32xf32> to vector<32x32xbf16>
    %18 = arith.truncf %16 : vector<32x128xf32> to vector<32x128xbf16>
    %cst_7 = arith.constant dense<0.000000e+00> : vector<32x128xf32>
    %19 = tpu.matmul %17, %18, %cst_7 {dimension_numbers = #tpu.dot_dimension_numbers<[1], [0], [0], [1], [0, 0, 1, 1], [], []>} : vector<32x32xbf16>, vector<32x128xbf16>, vector<32x128xf32> -> vector<32x128xf32>
    %20 = vector.broadcast %6 : vector<32x1xf32> to vector<32x128xf32>
    %21 = arith.addf %19, %20 : vector<32x128xf32>
    %cst_8 = arith.constant 0.000000e+00 : f32
    %22 = vector.broadcast %cst_8 : f32 to vector<32x128xf32>
    %23 = arith.maximumf %21, %22 : vector<32x128xf32>
    %24 = arith.truncf %3 : vector<32x32xf32> to vector<32x32xbf16>
    %25 = arith.truncf %23 : vector<32x128xf32> to vector<32x128xbf16>
    %cst_9 = arith.constant dense<0.000000e+00> : vector<32x128xf32>
    %26 = tpu.matmul %24, %25, %cst_9 {dimension_numbers = #tpu.dot_dimension_numbers<[1], [0], [0], [1], [0, 0, 1, 1], [], []>} : vector<32x32xbf16>, vector<32x128xbf16>, vector<32x128xf32> -> vector<32x128xf32>
    %27 = vector.broadcast %7 : vector<32x1xf32> to vector<32x128xf32>
    %28 = arith.addf %26, %27 : vector<32x128xf32>
    %cst_10 = arith.constant 0.000000e+00 : f32
    %29 = vector.broadcast %cst_10 : f32 to vector<32x128xf32>
    %30 = arith.maximumf %28, %29 : vector<32x128xf32>
    %31 = vector.broadcast %8 : vector<32x1xf32> to vector<32x128xf32>
    %32 = arith.mulf %30, %31 : vector<32x128xf32>
    %cst_11 = arith.constant dense<0.000000e+00> : vector<128xf32>
    %33 = vector.multi_reduction <add>, %32, %cst_11 [0] : vector<32x128xf32> to vector<128xf32>
    %34 = vector.shape_cast %33 : vector<128xf32> to vector<1x128xf32>
    %35 = vector.broadcast %9 : vector<1x1xf32> to vector<1x128xf32>
    %36 = arith.addf %34, %35 : vector<1x128xf32>
    %c0_12 = arith.constant 0 : index
    %c0_13 = arith.constant 0 : index
    %37 = vector.load %arg2[%c0_12, %c0_13] : memref<1x128xf32, #tpu.memory_space<vmem>>, vector<1x128xf32>
    tpu.vector_store %arg2[%c0_12, %c0_13], %36 {strides = array<i32>} : memref<1x128xf32, #tpu.memory_space<vmem>>, vector<1x128xf32>,
    return
  }
}

</mosaic_0001>

<bundles_post_ra>
// kernel: tpu_custom_call.1
= control target key start
LH: loop header
LB: loop body
LE: loop exit
PB: predicated region body
PF: predicated region fallthrough
CT: control target
= control target key end

     0   :  { %vm57_vm0 = vcmask 261120   ;;  %v406_v7 = vmov 0   ;;  %s518_s0 = inlined_call_operand.vmem [shape: f32[32,128], index: 0, kind: input, shape index: {}]   ;;  %s519_s1 = inlined_call_operand.vmem [shape: f32[128,32], index: 1, kind: input, shape index: {}]   ;;  %s520_s2 = inlined_call_operand.hbm [shape: f32[1,128], index: 2, kind: output, shape index: {}]  }
   0x1   :  { %v13_v0 = vld [vmem:[%s518_s0] sm:$0xff]  ;;  %v14_v1 = vld [vmem:[%s518_s0 + $0x8] sm:$0xff]  ;;  %v15_v2 = vld [vmem:[%s518_s0 + $0x10] sm:$0xff]  ;;  %372 = vset.pattern.permute.xlu0 %v406_v7  ;;  %373 = vset.pattern.permute.xlu1 %v406_v7 }
   0x2   :  { %v35_v3 = vpack.c.bf16 %v14_v1, %v13_v0  ;;  %v16_v4 = vld [vmem:[%s518_s0 + $0x18] sm:$0xff]  ;;  %v17_v5 = vld [vmem:[%s519_s1] sm:$0xff]  ;;  %v18_v6 = vld [vmem:[%s519_s1 + $0x8] sm:$0xff] }
   0x3   :  { %v36_v8 = vpack.c.bf16 %v16_v4, %v15_v2  ;;  %v33_v9 = vpack.c.bf16 %v18_v6, %v17_v5  ;;  %v448_v10 = vld [vmem:[%s519_s1 + $0x60] sm:$0xff]  ;;  %v19_v11 = vld [vmem:[%s519_s1 + $0x10] sm:$0xff]  ;;  %v20_v13 = vld [vmem:[%s519_s1 + $0x18] sm:$0xff] }
   0x4   :  { %342 = vmatprep.subr.bf16.mxu0 %v35_v3  ;;  %39 = vperm.xlu0 %372, %v448_v10   ;;  %v457_v12 = vld [vmem:[%s519_s1 + $0x70] sm:$0xff]  ;;  %v30_v14 = vld [vmem:[%s519_s1 + $0x68] sm:$0xff] }
   0x5   :  { %343 = vmatpush3.bf16.msra.mxu0 %v35_v3  ;;  %346 = vmatprep.mubr.msk.bf16.mxu0 %vm57_vm0, %v33_v9 }
   0x6   :  { %7 = vsyncpa [#allocation3], 0  ;;  %344 = vmatprep.subr.bf16.mxu0 %v36_v8  ;;  %49 = vperm.xlu1 %373, %v457_v12   ;;  %v32_v15 = vld [vmem:[%s519_s1 + $0x78] sm:$0xff]  ;;  %v34_v16 = vpack.c.bf16 %v20_v13, %v19_v11  ;;  %v21_v17 = vld [vmem:[%s519_s1 + $0x20] sm:$0xff]  ;;  %v407_v20 = vmov 1   ;;  %v408_v45 = vmov 2  }
   0x7   :  { %v22_v18 = vld [vmem:[%s519_s1 + $0x28] sm:$0xff]  ;;  %v23_v39 = vld [vmem:[%s519_s1 + $0x30] sm:$0xff]  ;;  %v24_v40 = vld [vmem:[%s519_s1 + $0x38] sm:$0xff]  ;;  %v409_v46 = vmov 3   ;;  %v410_v47 = vmov 4  }
   0x8   :  { %44 = vperm.xlu0 %372, %v30_v14   ;;  %v117_v19 = vpack.c.bf16 %v22_v18, %v21_v17  ;;  %v118_v41 = vpack.c.bf16 %v24_v40, %v23_v39  ;;  %v25_v42 = vld [vmem:[%s519_s1 + $0x40] sm:$0xff]  ;;  %v26_v43 = vld [vmem:[%s519_s1 + $0x48] sm:$0xff]  ;;  %v27_v2 = vld [vmem:[%s519_s1 + $0x50] sm:$0xff] }
   0x9   :  { %345 = vmatpush3.bf16.msra.mxu0 %v36_v8  ;;  %v196_v44 = vpack.c.bf16 %v26_v43, %v25_v42  ;;  %v28_v3 = vld [vmem:[%s519_s1 + $0x58] sm:$0xff]  ;;  %s411_s1 = smov [#allocation2]  }
   0xa   :  { %54 = vperm.xlu1 %373, %v32_v15   ;;  %354 = vmatprep.mubr.msk.bf16.mxu1 %vm57_vm0, %v117_v19  ;;  %v197_v4 = vpack.c.bf16 %v28_v3, %v27_v2  ;;  %s316_s20 = sshll.u32 %s411_s1, 4  ;;  %s317_s20 = int_to_ptr.vmem [resolvable:$true] %s316_s20 }
   0xb   :  { %s382_s21 = scalar_lea.vmem %s317_s20, 16  ;;  %s386_s22 = scalar_lea.vmem %s317_s20, 32 }
   0xc   :  { %347 = vmatmul.mubr.msk.bf16.vlgmr.msra.gmra.mrb[0].mxu0 %vm57_vm0, %v34_v16  ;;  %374 = vset.pattern.permute.xlu0 %v407_v20  ;;  %p383_p0 = scmp.ne.s32.totalorder %s317_s20, %s382_s21  ;;  %p387_p1 = scmp.lt.s32.totalorder %s317_s20, %s317_s20 }
   0xd   :  { %122 = vperm.xlu0 %374, %v448_v10   ;;  %362 = vmatprep.mubr.msk.bf16.mxu0 %vm57_vm0, %v196_v44  ;;  %p388_p2 = scmp.lt.s32.totalorder %s386_s22, %s382_s21 }
   0xe   :  { %375 = vset.pattern.permute.xlu1 %v407_v20 }
   0xf   :  { %126 = vperm.xlu1 %375, %v30_v14   ;;  %p389_p3 = por %p388_p2, %p387_p1 }
  0x11   :  { %134 = vperm.xlu0 %374, %v32_v15   ;;  %p390_p4 = pnand %p389_p3, %p383_p0 }
  0x13   :  { %130 = vperm.xlu1 %375, %v457_v12  }
  0x15   :  { %377 = vset.pattern.permute.xlu0 %v408_v45 }
  0x16   :  { %205 = vperm.xlu0 %377, %v30_v14  }
  0x17   :  { %376 = vset.pattern.permute.xlu1 %v408_v45 }
  0x18   :  { %201 = vperm.xlu1 %376, %v448_v10  }
  0x1a   :  { %378 = vset.pattern.permute.xlu0 %v409_v46 }
  0x1b   :  { %276 = vperm.xlu0 %378, %v448_v10  }
  0x1c   :  { %209 = vperm.xlu1 %376, %v457_v12  }
  0x1f   :  { %288 = vperm.xlu0 %378, %v32_v15  }
  0x20   :  { %213 = vperm.xlu1 %376, %v32_v15  }
  0x23   :  { %381 = vset.pattern.permute.xlu0 %v410_v47 }
  0x24   :  { %379 = vset.pattern.permute.xlu1 %v409_v46 }
  0x25   :  { %280 = vperm.xlu1 %379, %v30_v14  }
  0x29   :  { %284 = vperm.xlu1 %379, %v457_v12  }
  0x2d   :  { %380 = vset.pattern.permute.xlu1 %v410_v47 }
  0x2e   :  { %305 = vperm.xlu1 %380, %v448_v10  }
  0x83   :  { %v40_v22 = vpop.permute.xlu0 %39 }
  0x85   :  { %v50_v21 = vpop.permute.xlu1 %49 }
  0x87   :  { %v45_v29 = vpop.permute.xlu0 %44 }
  0x89   :  { %v55_v24 = vpop.permute.xlu1 %54 }
  0x8c   :  { %v123_v49 = vpop.permute.xlu0 %122 }
  0x8e   :  { %v127_v48 = vpop.permute.xlu1 %126 }
  0x90   :  { %v135_v52 = vpop.permute.xlu0 %134 }
  0x92   :  { %v131_v50 = vpop.permute.xlu1 %130 }
  0x95   :  { %v206_v8 = vpop.permute.xlu0 %205 }
  0x97   :  { %v202_v5 = vpop.permute.xlu1 %201 }
  0x9a   :  { %v277_v15 = vpop.permute.xlu0 %276 }
  0x9b   :  { %v210_v6 = vpop.permute.xlu1 %209 }
  0x9f   :  { %v214_v7 = vpop.permute.xlu1 %213 }
  0xa4   :  { %v281_v10 = vpop.permute.xlu1 %280 }
  0xdf   :  { %v348_v23 = vpop.f32.mrb[0].mxu0 }
  0xe0   :  { %v107_v25 = vadd.f32 %v348_v23, %v50_v21  ;;  %v98_v26 = vpop.f32.mrb[1].mxu0 }
  0xe1   :  { %v99_v27 = vadd.f32 %v98_v26, %v40_v22  ;;  %v349_v28 = vpop.f32.mrb[2].mxu0  ;;  %v285_v22 = vpop.permute.xlu1 %284 }
  0xe2   :  { %v110_v30 = vadd.f32 %v349_v28, %v55_v24  ;;  %v101_v31 = vpop.f32.mrb[3].mxu0  ;;  %v115_v33 = vmax.f32 %v107_v25, 0.0  ;;  %v289_v26 = vpop.permute.xlu0 %288 }
  0xe3   :  { %v102_v32 = vadd.f32 %v101_v31, %v45_v29  ;;  %v113_v35 = vmax.f32 %v99_v27, 0.0 }
  0xe4   :  { %v116_v34 = vmax.f32 %v110_v30, 0.0 }
  0xe5   :  { %v114_v36 = vmax.f32 %v102_v32, 0.0 }
  0xe6   :  { %v120_v37 = vpack.c.bf16 %v116_v34, %v115_v33 }
  0xe7   :  { %v119_v38 = vpack.c.bf16 %v114_v36, %v113_v35 }
  0xe9   :  { %350 = vmatprep.subr.bf16.mxu1 %v119_v38 }
  0xea   :  { %351 = vmatpush3.bf16.msra.mxu1 %v119_v38 }
  0xeb   :  { %352 = vmatprep.subr.bf16.mxu1 %v120_v37 }
  0xee   :  { %353 = vmatpush3.bf16.msra.mxu1 %v120_v37  ;;  %v306_v37 = vpop.permute.xlu1 %305 }
  0xf1   :  { %355 = vmatmul.mubr.msk.bf16.vlgmr.msra.gmra.mrb[0].mxu1 %vm57_vm0, %v118_v41 }
 0x1c4   :  { %v356_v51 = vpop.f32.mrb[0].mxu1 }
 0x1c5   :  { %v186_v53 = vadd.f32 %v356_v51, %v131_v50  ;;  %v177_v54 = vpop.f32.mrb[1].mxu1 }
 0x1c6   :  { %v178_v55 = vadd.f32 %v177_v54, %v123_v49  ;;  %v357_v56 = vpop.f32.mrb[2].mxu1 }
 0x1c7   :  { %v189_v57 = vadd.f32 %v357_v56, %v135_v52  ;;  %v180_v58 = vpop.f32.mrb[3].mxu1  ;;  %v194_v60 = vmax.f32 %v186_v53, 0.0 }
 0x1c8   :  { %v181_v59 = vadd.f32 %v180_v58, %v127_v48  ;;  %v192_v62 = vmax.f32 %v178_v55, 0.0 }
 0x1c9   :  { %v195_v61 = vmax.f32 %v189_v57, 0.0 }
 0x1ca   :  { %v193_v63 = vmax.f32 %v181_v59, 0.0 }
 0x1cb   :  { %v199_v0 = vpack.c.bf16 %v195_v61, %v194_v60 }
 0x1cc   :  { %v198_v1 = vpack.c.bf16 %v193_v63, %v192_v62 }
 0x1ce   :  { %358 = vmatprep.subr.bf16.mxu0 %v198_v1 }
 0x1cf   :  { %359 = vmatpush3.bf16.msra.mxu0 %v198_v1 }
 0x1d0   :  { %360 = vmatprep.subr.bf16.mxu0 %v199_v0 }
 0x1d3   :  { %361 = vmatpush3.bf16.msra.mxu0 %v199_v0 }
 0x1d6   :  { %363 = vmatmul.mubr.msk.bf16.vlgmr.msra.gmra.mrb[4].mxu0 %vm57_vm0, %v197_v4 }
 0x2a9   :  { %v364_v9 = vpop.f32.mrb[4].mxu0 }
 0x2aa   :  { %v256_v11 = vpop.f32.mrb[5].mxu0  ;;  %v265_v12 = vadd.f32 %v364_v9, %v210_v6 }
 0x2ab   :  { %v257_v13 = vadd.f32 %v256_v11, %v202_v5  ;;  %v365_v14 = vpop.f32.mrb[6].mxu0 }
 0x2ac   :  { %v259_v16 = vpop.f32.mrb[7].mxu0  ;;  %v268_v18 = vadd.f32 %v365_v14, %v214_v7  ;;  %v273_v20 = vmax.f32 %v265_v12, 0.0 }
 0x2ad   :  { %v271_v17 = vmax.f32 %v257_v13, 0.0  ;;  %v260_v19 = vadd.f32 %v259_v16, %v206_v8 }
 0x2ae   :  { %v274_v24 = vmax.f32 %v268_v18, 0.0  ;;  %v293_v27 = vmul.f32 %v285_v22, %v273_v20 }
 0x2af   :  { %v272_v21 = vmax.f32 %v260_v19, 0.0  ;;  %v291_v23 = vmul.f32 %v277_v15, %v271_v17 }
 0x2b0   :  { %v294_v30 = vmul.f32 %v289_v26, %v274_v24 }
 0x2b1   :  { %v292_v25 = vmul.f32 %v281_v10, %v272_v21 }
 0x2b3   :  { %v295_v28 = vadd.f32 %v292_v25, %v291_v23 }
 0x2b5   :  { %v296_v29 = vadd.f32 %v295_v28, %v293_v27 }
 0x2b7   :  { %v297_v31 = vadd.f32 %v296_v29, %v294_v30 }
 0x2b9   :  { %v298_v32 = vrot.slane %v297_v31, 4 }
 0x2bb   :  { %v299_v33 = vadd.f32 %v298_v32, %v297_v31 }
 0x2bd   :  { %v300_v34 = vrot.slane %v299_v33, 2 }
 0x2bf   :  { %v301_v35 = vadd.f32 %v300_v34, %v299_v33 }
 0x2c1   :  { %v302_v36 = vrot.slane %v301_v35, 1 }
 0x2c3   :  { %v303_v38 = vadd.f32 %v302_v36, %v301_v35 }
 0x2c5   :  { %v308_v39 = vadd.f32 %v306_v37, %v303_v38 }
 0x2c7   :  { %309 = vst [vmem:[#allocation2] sm:$0x1] %v308_v39 }
 0x2c8   :  { %393 = shalt.err (!%p390_p4)
}
 0x2c9   :  { %s394_s24 = scalar_lea.hbm %s520_s2, 16 }
 0x2ca   :  { %p395_p5 = scmp.ne.s32.totalorder %s520_s2, %s394_s24  ;;  %p398_p6 = scmp.lt.u32.totalorder %s394_s24, %s520_s2 }
 0x2cc   :  { %p400_p7 = pnand %p398_p6, %p395_p5 }
 0x2ce   :  { %403 = shalt.err (!%p400_p7)
}
 0x2cf   :  { %319 = dma.vmem_to_hbm [thread:$0]  %s317_s20, 16, %s520_s2, [#allocation3]  }
 0x2d0   :  { %404 = dma.done.wait [#allocation3], 16  }
 0x2d1   :  { %405 = vsyncadd [#allocation3], 4294967280 }
 0x2d2   :  { %323 = vsyncpa [#allocation3], 1 }

</bundles_post_ra>
